<compile_context>
chip_gen: v7x
topology: tpu7x:2x2x1
jax: 0.10.0
libtpu: 0.0.40
codegen_flags: <defaults>
</compile_context>

<pallas_src>
import functools

import jax
import jax.numpy as jnp
from jax import lax
from jax.experimental import pallas as pl
from jax.experimental.pallas import tpu as pltpu


def _activate(y, activation):
    if activation == "relu":
        return jnp.maximum(y, 0.0)
    if activation == "elu":
        return jnp.where(y > 0, y, jnp.expm1(y))
    if activation in ("linear", "none", None):
        return y
    raise NotImplementedError(f"activation {activation!r}")


def double_conv_kernel(x_ref, w1_ref, b1_ref, w2_ref, b2_ref, out_ref, *,
                       b_tile, H, activation):
    """One grid step = B_TILE images stacked along the row (sublane) axis.

    x_ref  : (B_TILE, H, W*CIN)    bf16  lane-packed input
    w1_ref : (3, W*CIN,  W*COUT)   bf16  banded conv1 weights (one slab per ky)
    b1_ref : (1, W*COUT)           f32   conv1 bias tiled across W
    w2_ref : (3, W*COUT, W*COUT)   bf16  banded conv2 weights
    b2_ref : (1, W*COUT)           f32
    out_ref: (B_TILE, H, W*COUT)   bf16  lane-dense output
    """
    M = b_tile * H

    def conv3x3(src_f32, src_bf16, w_ref, b_ref):
        # ky=1 uses the source as-is; ky=0/ky=2 are +/-1-row rolls with the
        # per-image boundary row zeroed so shifts neither wrap around the tile
        # nor leak between adjacent images stacked along M.
        rows = lax.broadcasted_iota(jnp.int32, src_f32.shape, 0) % H
        up = jnp.where(rows != 0, pltpu.roll(src_f32, shift=1, axis=0), 0.0)
        dn = jnp.where(rows != H - 1, pltpu.roll(src_f32, shift=M - 1, axis=0), 0.0)
        acc = jnp.dot(src_bf16, w_ref[1], preferred_element_type=jnp.float32)
        acc += jnp.dot(up.astype(jnp.bfloat16), w_ref[0],
                       preferred_element_type=jnp.float32)
        acc += jnp.dot(dn.astype(jnp.bfloat16), w_ref[2],
                       preferred_element_type=jnp.float32)
        return _activate(acc + b_ref[...], activation)     # f32 epilogue

    # (B_TILE, H, K) -> (M, K): free, the lane dimension is unchanged.
    x_bf = x_ref[...].reshape(M, x_ref.shape[-1])
    h1 = conv3x3(x_bf.astype(jnp.float32), x_bf, w1_ref, b1_ref)   # (M, W*COUT) f32
    h2 = conv3x3(h1, h1.astype(jnp.bfloat16), w2_ref, b2_ref)
    out_ref[...] = h2.astype(out_ref.dtype).reshape(out_ref.shape)


def _banded_weights(w_oihw, W):
    """Scatter OIHW 3x3 conv weights into 3 banded (W*CIN, W*COUT) matrices.

    B[ky, j*CIN+ci, x*COUT+co] = w[co, ci, ky, kx] with kx = j - x + 1 in [0, 3);
    this encodes the kx taps AND the W-direction 'same' padding (boundary output
    columns simply have fewer contributing blocks).
    """
    COUT, CIN, KH, KW = w_oihw.shape
    assert KH == 3 and KW == 3, "kernel is specialized to k_size=3"
    w = jnp.transpose(w_oihw, (2, 3, 1, 0))                 # (ky, kx, ci, co)
    j = jnp.arange(W)[None, :, None]
    x = jnp.arange(W)[None, None, :]
    kx = jnp.arange(KW)[:, None, None]
    band = (j == x + kx - 1).astype(w.dtype)                # (kx, j, x)
    B = jnp.einsum("kjx,ykio->yjixo", band, w)              # (ky, j, ci, x, co)
    return B.reshape(KH, W * CIN, W * COUT)


def _pick_batch_tile(N, H, target_m=256):
    """Largest divisor of N with B_TILE*H <= target_m, preferring grid len >= 2
    (v7x has 2 TensorCores per chip; a grid of (1,) idles one of them)."""
    divs = [d for d in range(1, N + 1) if N % d == 0 and d * H <= target_m]
    if not divs:
        return 1
    multi = [d for d in divs if N // d >= 2]
    return max(multi) if multi else max(divs)


def double_conv_block_pallas(x_nhwc, w1_oihw, b1, w2_oihw, b2, *,
                             activation="relu", out_dtype=jnp.bfloat16):
    """Fused DoubleConvBlock forward.  x_nhwc: (N, H, W, CIN) -> (N, H, W, COUT)."""
    N, H, W, CIN = x_nhwc.shape
    COUT = w1_oihw.shape[0]
    Wci, Wco = W * CIN, W * COUT

    b_tile = _pick_batch_tile(N, H)
    grid = (N // b_tile,)

    # One-time parameter / layout prep (cached per model in real use).
    x_lanes = x_nhwc.reshape(N, H, Wci).astype(jnp.bfloat16)     # lane-packed, bf16 HBM
    w1_k = _banded_weights(w1_oihw, W).astype(jnp.bfloat16)      # (3, W*CIN,  W*COUT)
    w2_k = _banded_weights(w2_oihw, W).astype(jnp.bfloat16)      # (3, W*COUT, W*COUT)
    b1_k = jnp.tile(b1.astype(jnp.float32), W)[None, :]          # (1, W*COUT)
    b2_k = jnp.tile(b2.astype(jnp.float32), W)[None, :]

    kernel = functools.partial(double_conv_kernel, b_tile=b_tile, H=H,
                               activation=activation)

    out = pl.pallas_call(
        kernel,
        out_shape=jax.ShapeDtypeStruct((N, H, Wco), out_dtype),
        grid_spec=pltpu.PrefetchScalarGridSpec(
            num_scalar_prefetch=0,
            grid=grid,
            in_specs=[
                pl.BlockSpec((b_tile, H, Wci), lambda n: (n, 0, 0)),
                pl.BlockSpec((3, Wci, Wco), lambda n: (0, 0, 0)),
                pl.BlockSpec((1, Wco), lambda n: (0, 0)),
                pl.BlockSpec((3, Wco, Wco), lambda n: (0, 0, 0)),
                pl.BlockSpec((1, Wco), lambda n: (0, 0)),
            ],
            out_specs=pl.BlockSpec((b_tile, H, Wco), lambda n: (n, 0, 0)),
        ),
        compiler_params=pltpu.CompilerParams(
            dimension_semantics=("parallel",)),
    )(x_lanes, w1_k, b1_k, w2_k, b2_k)

    return out.reshape(N, H, W, COUT)


def double_conv_block_reference(x_nchw, w1, b1, w2, b2, activation="relu"):
    """Pure-JAX reference matching the PyTorch module (NCHW / OIHW, f32)."""
    def conv_act(x, w, b):
        y = lax.conv_general_dilated(
            x, w, window_strides=(1, 1), padding=((1, 1), (1, 1)),
            dimension_numbers=("NCHW", "OIHW", "NCHW"))
        return _activate(y + b[None, :, None, None], activation)
    return conv_act(conv_act(x_nchw, w1, b1), w2, b2)


if __name__ == "__main__":
    # N=4 exercises both the batch-tiling path (B_TILE=2 -> 2 images per grid
    # step, image-boundary masks active) and a grid length of 2.
    N, CIN, H, W, COUT = 4, 4, 16, 16, 8

    key = jax.random.PRNGKey(0)
    ks = jax.random.split(key, 5)
    x = jax.random.normal(ks[0], (N, CIN, H, W), jnp.float32)             # NCHW like PyTorch
    w1 = 0.1 * jax.random.normal(ks[1], (COUT, CIN, 3, 3), jnp.float32)   # OIHW
    b1 = 0.1 * jax.random.normal(ks[2], (COUT,), jnp.float32)
    w2 = 0.1 * jax.random.normal(ks[3], (COUT, COUT, 3, 3), jnp.float32)
    b2 = 0.1 * jax.random.normal(ks[4], (COUT,), jnp.float32)

    # Single NCHW<->NHWC transpose at the model boundary; the kernel itself works
    # in the lane-dense NHWC-packed layout.
    x_nhwc = jnp.transpose(x, (0, 2, 3, 1))
    out_nhwc = double_conv_block_pallas(x_nhwc, w1, b1, w2, b2, activation="relu")
    out_nhwc = jax.block_until_ready(out_nhwc)
    out = jnp.transpose(out_nhwc.astype(jnp.float32), (0, 3, 1, 2))       # back to NCHW

    ref = jax.block_until_ready(
        double_conv_block_reference(x, w1, b1, w2, b2, activation="relu"))

    assert out.shape == (N, COUT, H, W), out.shape
    max_err = float(jnp.max(jnp.abs(out - ref)))
    # bf16 MXU operands, bf16 intermediate and bf16 output vs a pure-f32
    # reference -> a few 1e-3..1e-2 of error is expected.
    assert jnp.allclose(out, ref, atol=3e-2, rtol=3e-2), max_err

    print("KERNEL_OK")
</pallas_src>

<mosaic_0001>
module attributes {stable_mosaic.version = 11 : i64} {
  func.func @double_conv_kernel(%arg0: i32, %arg1: memref<2x16x64xbf16, #tpu.memory_space<vmem>>, %arg2: memref<3x64x128xbf16, #tpu.memory_space<vmem>>, %arg3: memref<1x128xf32, #tpu.memory_space<vmem>>, %arg4: memref<3x128x128xbf16, #tpu.memory_space<vmem>>, %arg5: memref<1x128xf32, #tpu.memory_space<vmem>>, %arg6: memref<2x16x128xbf16, #tpu.memory_space<vmem>>) attributes {dimension_semantics = [#tpu.dimension_semantics<parallel>], iteration_bounds = array<i64: 2>, scalar_prefetch = 0 : i64, scratch_operands = 0 : i64, tpu.core_type = #tpu.core_type<tc>, window_params = [{transform_indices = @transform_0, window_bounds = array<i64: 2, 16, 64>}, {pipeline_mode = #tpu.pipeline_mode<synchronous>, transform_indices = @transform_1, window_bounds = array<i64: 3, 64, 128>}, {pipeline_mode = #tpu.pipeline_mode<synchronous>, transform_indices = @transform_2, window_bounds = array<i64: 1, 128>}, {pipeline_mode = #tpu.pipeline_mode<synchronous>, transform_indices = @transform_3, window_bounds = array<i64: 3, 128, 128>}, {pipeline_mode = #tpu.pipeline_mode<synchronous>, transform_indices = @transform_4, window_bounds = array<i64: 1, 128>}, {transform_indices = @transform_5, window_bounds = array<i64: 2, 16, 128>}]} {
    %c0 = arith.constant 0 : index
    %c0_0 = arith.constant 0 : index
    %c0_1 = arith.constant 0 : index
    %0 = vector.load %arg1[%c0, %c0_0, %c0_1] : memref<2x16x64xbf16, #tpu.memory_space<vmem>>, vector<2x16x64xbf16>
    %1 = vector.shape_cast %0 : vector<2x16x64xbf16> to vector<32x64xbf16>
    %2 = arith.extf %1 : vector<32x64xbf16> to vector<32x64xf32>
    %3 = tpu.iota {dimensions = array<i32: 0>} : vector<32x64xi32>
    %c16_i32 = arith.constant 16 : i32
    %c0_i32 = arith.constant 0 : i32
    %4 = arith.cmpi eq, %c16_i32, %c0_i32 : i32
    %c1_i32 = arith.constant 1 : i32
    %5 = arith.select %4, %c1_i32, %c16_i32 : i32
    %6 = vector.broadcast %5 : i32 to vector<32x64xi32>
    %7 = arith.remsi %3, %6 : vector<32x64xi32>
    %c0_i32_2 = arith.constant 0 : i32
    %8 = vector.broadcast %c0_i32_2 : i32 to vector<32x64xi32>
    %9 = arith.cmpi ne, %7, %8 : vector<32x64xi32>
    %c0_i32_3 = arith.constant 0 : i32
    %10 = vector.broadcast %c0_i32_3 : i32 to vector<32x64xi32>
    %11 = arith.cmpi slt, %7, %10 : vector<32x64xi32>
    %c0_i32_4 = arith.constant 0 : i32
    %12 = arith.cmpi slt, %5, %c0_i32_4 : i32
    %13 = vector.broadcast %12 : i1 to vector<32x64xi1>
    %14 = vector.broadcast %13 : vector<32x64xi1> to vector<32x64xi1>
    %15 = arith.xori %11, %14 : vector<32x64xi1>
    %16 = arith.andi %15, %9 : vector<32x64xi1>
    %17 = vector.broadcast %5 : i32 to vector<32x64xi32>
    %18 = arith.addi %7, %17 : vector<32x64xi32>
    %19 = arith.select %16, %18, %7 : vector<32x64xi1>, vector<32x64xi32>
    %c0_i32_5 = arith.constant 0 : i32
    %20 = vector.broadcast %c0_i32_5 : i32 to vector<32x64xi32>
    %21 = arith.cmpi ne, %19, %20 : vector<32x64xi32>
    %c1_i32_6 = arith.constant 1 : i32
    %22 = tpu.dynamic_rotate %2 by %c1_i32_6 dim 0 : vector<32x64xf32>, i32 -> vector<32x64xf32>
    %cst = arith.constant 0.000000e+00 : f32
    %23 = vector.broadcast %cst : f32 to vector<32x64xf32>
    %24 = arith.select %21, %22, %23 : vector<32x64xi1>, vector<32x64xf32>
    %c15_i32 = arith.constant 15 : i32
    %25 = vector.broadcast %c15_i32 : i32 to vector<32x64xi32>
    %26 = arith.cmpi ne, %19, %25 : vector<32x64xi32>
    %c31_i32 = arith.constant 31 : i32
    %27 = tpu.dynamic_rotate %2 by %c31_i32 dim 0 : vector<32x64xf32>, i32 -> vector<32x64xf32>
    %cst_7 = arith.constant 0.000000e+00 : f32
    %28 = vector.broadcast %cst_7 : f32 to vector<32x64xf32>
    %29 = arith.select %26, %27, %28 : vector<32x64xi1>, vector<32x64xf32>
    %c1 = arith.constant 1 : index
    %c0_8 = arith.constant 0 : index
    %c0_9 = arith.constant 0 : index
    %30 = vector.load %arg2[%c1, %c0_8, %c0_9] : memref<3x64x128xbf16, #tpu.memory_space<vmem>>, vector<1x64x128xbf16>
    %31 = vector.shape_cast %30 : vector<1x64x128xbf16> to vector<64x128xbf16>
    %cst_10 = arith.constant dense<0.000000e+00> : vector<32x128xf32>
    %32 = tpu.matmul %1, %31, %cst_10 {dimension_numbers = #tpu.dot_dimension_numbers<[1], [0], [0], [1], [0, 0, 1, 1], [], []>} : vector<32x64xbf16>, vector<64x128xbf16>, vector<32x128xf32> -> vector<32x128xf32>
    %33 = arith.truncf %24 : vector<32x64xf32> to vector<32x64xbf16>
    %c0_11 = arith.constant 0 : index
    %c0_12 = arith.constant 0 : index
    %c0_13 = arith.constant 0 : index
    %34 = vector.load %arg2[%c0_11, %c0_12, %c0_13] : memref<3x64x128xbf16, #tpu.memory_space<vmem>>, vector<1x64x128xbf16>
    %35 = vector.shape_cast %34 : vector<1x64x128xbf16> to vector<64x128xbf16>
    %cst_14 = arith.constant dense<0.000000e+00> : vector<32x128xf32>
    %36 = tpu.matmul %33, %35, %cst_14 {dimension_numbers = #tpu.dot_dimension_numbers<[1], [0], [0], [1], [0, 0, 1, 1], [], []>} : vector<32x64xbf16>, vector<64x128xbf16>, vector<32x128xf32> -> vector<32x128xf32>
    %37 = arith.addf %32, %36 : vector<32x128xf32>
    %38 = arith.truncf %29 : vector<32x64xf32> to vector<32x64xbf16>
    %c2 = arith.constant 2 : index
    %c0_15 = arith.constant 0 : index
    %c0_16 = arith.constant 0 : index
    %39 = vector.load %arg2[%c2, %c0_15, %c0_16] : memref<3x64x128xbf16, #tpu.memory_space<vmem>>, vector<1x64x128xbf16>
    %40 = vector.shape_cast %39 : vector<1x64x128xbf16> to vector<64x128xbf16>
    %cst_17 = arith.constant dense<0.000000e+00> : vector<32x128xf32>
    %41 = tpu.matmul %38, %40, %cst_17 {dimension_numbers = #tpu.dot_dimension_numbers<[1], [0], [0], [1], [0, 0, 1, 1], [], []>} : vector<32x64xbf16>, vector<64x128xbf16>, vector<32x128xf32> -> vector<32x128xf32>
    %42 = arith.addf %37, %41 : vector<32x128xf32>
    %c0_18 = arith.constant 0 : index
    %c0_19 = arith.constant 0 : index
    %43 = vector.load %arg3[%c0_18, %c0_19] : memref<1x128xf32, #tpu.memory_space<vmem>>, vector<1x128xf32>
    %44 = vector.broadcast %43 : vector<1x128xf32> to vector<32x128xf32>
    %45 = arith.addf %42, %44 : vector<32x128xf32>
    %cst_20 = arith.constant 0.000000e+00 : f32
    %46 = vector.broadcast %cst_20 : f32 to vector<32x128xf32>
    %47 = arith.maximumf %45, %46 : vector<32x128xf32>
    %48 = arith.truncf %47 : vector<32x128xf32> to vector<32x128xbf16>
    %49 = tpu.iota {dimensions = array<i32: 0>} : vector<32x128xi32>
    %c16_i32_21 = arith.constant 16 : i32
    %c0_i32_22 = arith.constant 0 : i32
    %50 = arith.cmpi eq, %c16_i32_21, %c0_i32_22 : i32
    %c1_i32_23 = arith.constant 1 : i32
    %51 = arith.select %50, %c1_i32_23, %c16_i32_21 : i32
    %52 = vector.broadcast %51 : i32 to vector<32x128xi32>
    %53 = arith.remsi %49, %52 : vector<32x128xi32>
    %c0_i32_24 = arith.constant 0 : i32
    %54 = vector.broadcast %c0_i32_24 : i32 to vector<32x128xi32>
    %55 = arith.cmpi ne, %53, %54 : vector<32x128xi32>
    %c0_i32_25 = arith.constant 0 : i32
    %56 = vector.broadcast %c0_i32_25 : i32 to vector<32x128xi32>
    %57 = arith.cmpi slt, %53, %56 : vector<32x128xi32>
    %c0_i32_26 = arith.constant 0 : i32
    %58 = arith.cmpi slt, %51, %c0_i32_26 : i32
    %59 = vector.broadcast %58 : i1 to vector<32x128xi1>
    %60 = vector.broadcast %59 : vector<32x128xi1> to vector<32x128xi1>
    %61 = arith.xori %57, %60 : vector<32x128xi1>
    %62 = arith.andi %61, %55 : vector<32x128xi1>
    %63 = vector.broadcast %51 : i32 to vector<32x128xi32>
    %64 = arith.addi %53, %63 : vector<32x128xi32>
    %65 = arith.select %62, %64, %53 : vector<32x128xi1>, vector<32x128xi32>
    %c0_i32_27 = arith.constant 0 : i32
    %66 = vector.broadcast %c0_i32_27 : i32 to vector<32x128xi32>
    %67 = arith.cmpi ne, %65, %66 : vector<32x128xi32>
    %c1_i32_28 = arith.constant 1 : i32
    %68 = tpu.dynamic_rotate %47 by %c1_i32_28 dim 0 : vector<32x128xf32>, i32 -> vector<32x128xf32>
    %cst_29 = arith.constant 0.000000e+00 : f32
    %69 = vector.broadcast %cst_29 : f32 to vector<32x128xf32>
    %70 = arith.select %67, %68, %69 : vector<32x128xi1>, vector<32x128xf32>
    %c15_i32_30 = arith.constant 15 : i32
    %71 = vector.broadcast %c15_i32_30 : i32 to vector<32x128xi32>
    %72 = arith.cmpi ne, %65, %71 : vector<32x128xi32>
    %c31_i32_31 = arith.constant 31 : i32
    %73 = tpu.dynamic_rotate %47 by %c31_i32_31 dim 0 : vector<32x128xf32>, i32 -> vector<32x128xf32>
    %cst_32 = arith.constant 0.000000e+00 : f32
    %74 = vector.broadcast %cst_32 : f32 to vector<32x128xf32>
    %75 = arith.select %72, %73, %74 : vector<32x128xi1>, vector<32x128xf32>
    %c1_33 = arith.constant 1 : index
    %c0_34 = arith.constant 0 : index
    %c0_35 = arith.constant 0 : index
    %76 = vector.load %arg4[%c1_33, %c0_34, %c0_35] : memref<3x128x128xbf16, #tpu.memory_space<vmem>>, vector<1x128x128xbf16>
    %77 = vector.shape_cast %76 : vector<1x128x128xbf16> to vector<128x128xbf16>
    %cst_36 = arith.constant dense<0.000000e+00> : vector<32x128xf32>
    %78 = tpu.matmul %48, %77, %cst_36 {dimension_numbers = #tpu.dot_dimension_numbers<[1], [0], [0], [1], [0, 0, 1, 1], [], []>} : vector<32x128xbf16>, vector<128x128xbf16>, vector<32x128xf32> -> vector<32x128xf32>
    %79 = arith.truncf %70 : vector<32x128xf32> to vector<32x128xbf16>
    %c0_37 = arith.constant 0 : index
    %c0_38 = arith.constant 0 : index
    %c0_39 = arith.constant 0 : index
    %80 = vector.load %arg4[%c0_37, %c0_38, %c0_39] : memref<3x128x128xbf16, #tpu.memory_space<vmem>>, vector<1x128x128xbf16>
    %81 = vector.shape_cast %80 : vector<1x128x128xbf16> to vector<128x128xbf16>
    %cst_40 = arith.constant dense<0.000000e+00> : vector<32x128xf32>
    %82 = tpu.matmul %79, %81, %cst_40 {dimension_numbers = #tpu.dot_dimension_numbers<[1], [0], [0], [1], [0, 0, 1, 1], [], []>} : vector<32x128xbf16>, vector<128x128xbf16>, vector<32x128xf32> -> vector<32x128xf32>
    %83 = arith.addf %78, %82 : vector<32x128xf32>
    %84 = arith.truncf %75 : vector<32x128xf32> to vector<32x128xbf16>
    %c2_41 = arith.constant 2 : index
    %c0_42 = arith.constant 0 : index
    %c0_43 = arith.constant 0 : index
    %85 = vector.load %arg4[%c2_41, %c0_42, %c0_43] : memref<3x128x128xbf16, #tpu.memory_space<vmem>>, vector<1x128x128xbf16>
    %86 = vector.shape_cast %85 : vector<1x128x128xbf16> to vector<128x128xbf16>
    %cst_44 = arith.constant dense<0.000000e+00> : vector<32x128xf32>
    %87 = tpu.matmul %84, %86, %cst_44 {dimension_numbers = #tpu.dot_dimension_numbers<[1], [0], [0], [1], [0, 0, 1, 1], [], []>} : vector<32x128xbf16>, vector<128x128xbf16>, vector<32x128xf32> -> vector<32x128xf32>
    %88 = arith.addf %83, %87 : vector<32x128xf32>
    %c0_45 = arith.constant 0 : index
    %c0_46 = arith.constant 0 : index
    %89 = vector.load %arg5[%c0_45, %c0_46] : memref<1x128xf32, #tpu.memory_space<vmem>>, vector<1x128xf32>
    %90 = vector.broadcast %89 : vector<1x128xf32> to vector<32x128xf32>
    %91 = arith.addf %88, %90 : vector<32x128xf32>
    %cst_47 = arith.constant 0.000000e+00 : f32
    %92 = vector.broadcast %cst_47 : f32 to vector<32x128xf32>
    %93 = arith.maximumf %91, %92 : vector<32x128xf32>
    %94 = arith.truncf %93 : vector<32x128xf32> to vector<32x128xbf16>
    %95 = vector.shape_cast %94 : vector<32x128xbf16> to vector<2x16x128xbf16>
    %c0_48 = arith.constant 0 : index
    %c0_49 = arith.constant 0 : index
    %c0_50 = arith.constant 0 : index
    %96 = vector.load %arg6[%c0_48, %c0_49, %c0_50] : memref<2x16x128xbf16, #tpu.memory_space<vmem>>, vector<2x16x128xbf16>
    tpu.vector_store %arg6[%c0_48, %c0_49, %c0_50], %95 {strides = array<i32>} : memref<2x16x128xbf16, #tpu.memory_space<vmem>>, vector<2x16x128xbf16>,
    return
  }
  func.func @transform_0(%arg0: i32) -> (i32, i32, i32) {
    %c0_i32 = arith.constant 0 : i32
    %c0_i32_0 = arith.constant 0 : i32
    %c0_i32_1 = arith.constant 0 : i32
    return %arg0, %c0_i32, %c0_i32_0 : i32, i32, i32
  }
  func.func @transform_1(%arg0: i32) -> (i32, i32, i32) {
    %c0_i32 = arith.constant 0 : i32
    %c0_i32_0 = arith.constant 0 : i32
    %c0_i32_1 = arith.constant 0 : i32
    %c0_i32_2 = arith.constant 0 : i32
    return %c0_i32, %c0_i32_0, %c0_i32_1 : i32, i32, i32
  }
  func.func @transform_2(%arg0: i32) -> (i32, i32) {
    %c0_i32 = arith.constant 0 : i32
    %c0_i32_0 = arith.constant 0 : i32
    %c0_i32_1 = arith.constant 0 : i32
    return %c0_i32, %c0_i32_0 : i32, i32
  }
  func.func @transform_3(%arg0: i32) -> (i32, i32, i32) {
    %c0_i32 = arith.constant 0 : i32
    %c0_i32_0 = arith.constant 0 : i32
    %c0_i32_1 = arith.constant 0 : i32
    %c0_i32_2 = arith.constant 0 : i32
    return %c0_i32, %c0_i32_0, %c0_i32_1 : i32, i32, i32
  }
  func.func @transform_4(%arg0: i32) -> (i32, i32) {
    %c0_i32 = arith.constant 0 : i32
    %c0_i32_0 = arith.constant 0 : i32
    %c0_i32_1 = arith.constant 0 : i32
    return %c0_i32, %c0_i32_0 : i32, i32
  }
  func.func @transform_5(%arg0: i32) -> (i32, i32, i32) {
    %c0_i32 = arith.constant 0 : i32
    %c0_i32_0 = arith.constant 0 : i32
    %c0_i32_1 = arith.constant 0 : i32
    return %arg0, %c0_i32, %c0_i32_0 : i32, i32, i32
  }
}

</mosaic_0001>

<bundles_post_ra>
// kernel: tpu_custom_call.1
= control target key start
LH: loop header
LB: loop body
LE: loop exit
PB: predicated region body
PF: predicated region fallthrough
CT: control target
= control target key end

     0   :  { %10 = vsyncpa [#allocation3], 0  ;;  %s2099_s0 = inlined_call_operand.hbm [shape: bf16[4,16,64], index: 0, kind: input, shape index: {}]   ;;  %s2100_s1 = inlined_call_operand.hbm [shape: bf16[3,64,128], index: 1, kind: input, shape index: {}]   ;;  %s2101_s2 = inlined_call_operand.vmem [shape: f32[1,128], index: 2, kind: input, shape index: {}]   ;;  %s2102_s3 = inlined_call_operand.hbm [shape: bf16[3,128,128], index: 3, kind: input, shape index: {}]   ;;  %s2103_s4 = inlined_call_operand.vmem [shape: f32[1,128], index: 4, kind: input, shape index: {}]   ;;  %s2104_s5 = inlined_call_operand.hbm [shape: bf16[4,16,128], index: 5, kind: output, shape index: {}]  }
   0x1   :  { %12 = vsyncpa [#allocation3 + $0x1], 0 }
   0x2   :  { %13 = vsyncpa [#allocation6], 0 }
   0x3   :  { %14 = vsyncpa [#allocation4], 0 }
   0x4   :  { %16 = vsyncpa [#allocation4 + $0x1], 0  ;;  %s1755_s18 = smov 0   ;;  %s1757_s19 = smov 0  }
   0x5   :  { %s1759_s20 = smov 0   ;;  %s1761_s21 = smov 0  }
   0x6 LB: > { %s1776_s22 = sadd.s32 4294967295, %s1714_s21   ;;  %s1185_s23 = sadd.s32 4294967294, %s1714_s21   ;;  %s1714_s21 = sphi %s1761_s21, %s2132_s21   ;;  %s1710_s20 = sphi %s1759_s20, %s2131_s20   ;;  %s1706_s19 = sphi %s1757_s19, %s2130_s19   ;;  %s1702_s18 = sphi %s1755_s18, %s2129_s18  }
   0x7   : > { %p42_p0 = scmp.ne.s32.totalorder %s1706_s19, %s1702_s18  ;;  %p2105_p1 = scmp.eq.s32.totalorder %s1776_s22, 0 }
   0x8   : > { %p156_p3 = scmp.eq.s32.totalorder %s1185_s23, 1  ;;  %p1186_p5 = scmp.ge.s32.totalorder %s1714_s21, 1 }
   0x9   : > { %p1785_p4 = por %p2105_p1, %p42_p0  ;;  %p163_p7 = scmp.lt.s32.totalorder %s1714_s21, 3 }
   0xa   : > { %p1790_p6 = por %p156_p3, %p42_p0  ;;  %s1716_s27 = smov [#allocation5]  }
   0xb   : > { %s2108_s24 = scalar_select %p1785_p4, 1, 0 }
   0xc   : > { %s2109_s25 = scalar_select %p1790_p6, 1, 0 }
   0xd   : > { %p1795_p8 = pnand %p1186_p5, %p163_p7  ;;  %s175_s28 = sshll.u32 %s1716_s27, 4  ;;  %s1799_s28 = int_to_ptr.vmem [resolvable:$true] %s175_s28 }
   0xe   : > { %s1717_s30 = smov [#allocation7]   ;;  %s1558_s9 = scalar_lea.hbm %s2100_s1, 1536 }
   0xf   : > { %p1458_p9 = pneg %p1795_p8  ;;  %s191_s6 = sshll.u32 %s1717_s30, 4  ;;  %s1810_s6 = int_to_ptr.vmem [resolvable:$true] %s191_s6 }
  0x10   : > { %p1559_p12 = scmp.ne.s32.totalorder %s2100_s1, %s1558_s9  ;;  %p1565_p5 = scmp.lt.u32.totalorder %s1558_s9, %s2100_s1 }
  0x11   : > { %p1806_p11 = pnand %p1458_p9, %p2105_p1 }
  0x13   : > { %p1560_p13 = pneg %p1806_p11 }
  0x15   : > { %p1561_p0 = pnand %p1560_p13, %p1559_p12 }
  0x17   : > { %p1562_p3 = pneg %p1561_p0 }
  0x19   : > { %p1567_p7 = pnand %p1565_p5, %p1562_p3 }
  0x1b   : > { %1570 = shalt.err (!%p1567_p7)
}
  0x1c   : > { %s1571_s14 = scalar_lea.vmem %s1799_s28, 1536  ;;  %p1579_p2 = scmp.lt.s32.totalorder %s1799_s28, %s1799_s28 }
  0x1d   : > { %p1572_p9 = scmp.ne.s32.totalorder %s1799_s28, %s1571_s14  ;;  %p1580_p12 = scmp.lt.s32.totalorder %s1571_s14, %s1571_s14 }
  0x1f   : > { %p1574_p10 = pnand %p1572_p9, %p1560_p13  ;;  %p1581_p0 = por %p1580_p12, %p1579_p2 }
  0x21   : > { %p1575_p1 = pneg %p1574_p10 }
  0x23   : > { %p1582_p6 = pnand %p1581_p0, %p1575_p1 }
  0x25   : > { %1585 = shalt.err (!%p1582_p6)
}
  0x26   : > { %s1718_s15 = smov 64   ;;  %s1719_s16 = smov 4  }
  0x27   : > { %1461 = dma.hbm_to_vmem [thread:$0]  (!%p1806_p11), %s2100_s1, 1536, %s1799_s28, [#allocation6], %s1718_s15, %s1718_s15, %s1719_s16  }
  0x28   : > { %s1586_s7 = scalar_lea.hbm %s2102_s3, 3072 }
  0x29   : > { %p1587_p1 = scmp.ne.s32.totalorder %s2102_s3, %s1586_s7  ;;  %p1593_p10 = scmp.lt.u32.totalorder %s1586_s7, %s2102_s3 }
  0x2b   : > { %p1589_p2 = pnand %p1587_p1, %p1560_p13 }
  0x2d   : > { %p1590_p6 = pneg %p1589_p2 }
  0x2f   : > { %p1595_p3 = pnand %p1593_p10, %p1590_p6 }
  0x31   : > { %1598 = shalt.err (!%p1595_p3)
}
  0x32   : > { %s1599_s28 = scalar_lea.vmem %s1810_s6, 3072  ;;  %p1607_p12 = scmp.lt.s32.totalorder %s1810_s6, %s1810_s6 }
  0x33   : > { %p1600_p5 = scmp.ne.s32.totalorder %s1810_s6, %s1599_s28  ;;  %p1608_p0 = scmp.lt.s32.totalorder %s1599_s28, %s1599_s28 }
  0x35   : > { %p1602_p7 = pnand %p1600_p5, %p1560_p13  ;;  %p1609_p1 = por %p1608_p0, %p1607_p12 }
  0x37   : > { %p1603_p9 = pneg %p1602_p7 }
  0x39   : > { %p1610_p2 = pnand %p1609_p1, %p1603_p9 }
  0x3b   : > { %1613 = shalt.err (!%p1610_p2)
}
  0x3c   : > { %1464 = dma.hbm_to_vmem [thread:$0]  (!%p1806_p11), %s2102_s3, 3072, %s1810_s6, [#allocation6], %s1718_s15, %s1718_s15, %s1719_s16  }
  0x3d   : > { %s1871_s29 = sadd.s32 1, %s1714_s21   ;;  %s29_s14 = sadd.s32 1, %s1710_s20 }
  0x3e   : > { %s26_s17 = ssub.s32 %s1714_s21, %s1871_s29  ;;  %p36_p13 = scmp.ne.s32.totalorder %s1710_s20, %s1706_s19 }
  0x3f   : > { %p27_p6 = scmp.eq.s32.totalorder %s26_s17, 0  ;;  %p37_p10 = scmp.eq.s32.totalorder %s1714_s21, 0 }
  0x40   : > { %p2112_p3 = scmp.eq.s32.totalorder %s1776_s22, 1  ;;  %p1475_p7 = scmp.lt.s32.totalorder %s1714_s21, 2 }
  0x41   : > { %s1887_s27 = scalar_select %p27_p6, %s1710_s20, %s29_s14  }
  0x42   : > { %p1881_p5 = por %p2112_p3, %p36_p13  ;;  %p38_p9 = por %p37_p10, %p36_p13 }
  0x43   : > { %s208_s30 = sand.u32 1, %s1710_s20   ;;  %s1268_s6 = sshll.u32 %s1714_s21, 8 }
  0x44   : > { %s2113_s23 = scalar_select %p1881_p5, 1, 0 }
  0x45   : > { %s1190_s7 = sshll.u32 %s208_s30, 4  ;;  %s1894_s10 = scalar_lea.hbm %s2099_s0, %s1268_s6 }
  0x46   : > { %s212_s11 = scalar_lea.vmem [#allocation2], %s1190_s7  ;;  %p1898_p11 = pnand %p1475_p7, %p38_p9 }
  0x47   : > { %s220_s28 = sshll.u32 %s212_s11, 4  ;;  %s1902_s13 = scalar_lea.sflag [#allocation3], %s208_s30  ;;  %s1896_s28 = int_to_ptr.vmem [resolvable:$true] %s220_s28 }
  0x48   : > { %s1614_s14 = scalar_lea.hbm %s1894_s10, 256  ;;  %p1616_p0 = pneg %p1898_p11 }
  0x49   : > { %p1615_p12 = scmp.ne.s32.totalorder %s1894_s10, %s1614_s14  ;;  %s1619_s6 = scalar_lea.hbm %s2099_s0, 512 }
  0x4a   : > { %p1620_p13 = scmp.lt.u32.totalorder %s1894_s10, %s2099_s0  ;;  %p1621_p6 = scmp.lt.u32.totalorder %s1619_s6, %s1614_s14 }
  0x4b   : > { %p1617_p1 = pnand %p1616_p0, %p1615_p12  ;;  %p1623_p3 = scmp.lt.u32.totalorder %s1614_s14, %s1894_s10 }
  0x4c   : > { %p1622_p10 = por %p1621_p6, %p1620_p13 }
  0x4d   : > { %p1618_p2 = pneg %p1617_p1 }
  0x4e   : > { %p1624_p7 = por %p1623_p3, %p1622_p10 }
  0x50   : > { %p1625_p9 = pnand %p1624_p7, %p1618_p2 }
  0x52   : > { %1628 = shalt.err (!%p1625_p9)
}
  0x53   : > { %s1629_s30 = scalar_lea.vmem %s1896_s28, 256  ;;  %s1720_s11 = smov [#allocation2]  }
  0x54   : > { %p1630_p12 = scmp.ne.s32.totalorder %s1896_s28, %s1629_s30  ;;  %s1634_s17 = sshll.u32 %s1720_s11, 4  ;;  %s1635_s17 = int_to_ptr.vmem [resolvable:$false] %s1634_s17 }
  0x55   : > { %s1636_s7 = scalar_lea.vmem %s1635_s17, 512  ;;  %p1637_p4 = scmp.lt.s32.totalorder %s1896_s28, %s1635_s17 }
  0x56   : > { %p1632_p1 = pnand %p1630_p12, %p1616_p0  ;;  %p1638_p13 = scmp.lt.s32.totalorder %s1636_s7, %s1629_s30 }
  0x58   : > { %p1633_p5 = pneg %p1632_p1  ;;  %p1639_p6 = por %p1638_p13, %p1637_p4 }
  0x5a   : > { %p1640_p10 = pnand %p1639_p6, %p1633_p5 }
  0x5c   : > { %1643 = shalt.err (!%p1640_p10)
}
  0x5d   : > { %1468 = dma.hbm_to_vmem [thread:$0]  (!%p1898_p11), %s1894_s10, 256, %s1896_s28, %s1902_s13, %s1718_s15, %s1718_s15, %s1719_s16  }
  0x5e   : > { %232 = sbr.rel (%p1795_p8) target bundleno = 646 (0x286), region = 40  ;;  %s1936_s14 = sand.u32 (!%p1795_p8), 1, %s1706_s19  }
  0x5f   : > { %s1195_s6 = sshll.u32 (!%p1795_p8), %s1936_s14, 4  ;;  %s235_s8 = scalar_lea.sflag (!%p1795_p8), [#allocation3], %s1936_s14 }
  0x60   : > { %s238_s12 = scalar_lea.vmem (!%p1795_p8), [#allocation2], %s1195_s6  ;;  %p2115_p4 = scmp.ne.s32.totalorder (!%p1795_p8), %s2108_s24, 0 }
  0x65   : > { %1689 = dma.done.wait (%p2115_p4), %s235_s8, 256  }
  0x66   : > { %1691 = vsyncadd (%p2115_p4), %s235_s8, 4294967040  ;;  %p2116_p5 = scmp.eq.s32.totalorder %s1776_s22, 0 }
  0x68   : > { %1693 = dma.done.wait (%p2116_p5), [#allocation6], 4608   ;;  %p2117_p8 = pmov %p2116_p5 }
  0x69   : > { %v284_v0 = vlaneseq  ;;  %v1518_v2 = vld [vmem:[#allocation5] sm:$0xff]   ;;  %v1519_v4 = vld [vmem:[#allocation5 + $0x8] sm:$0xff]   ;;  %v1520_v5 = vld [vmem:[#allocation5 + $0x10] sm:$0xff]   ;;  %vm414_vm3 = vcmask 523264   ;;  %vm1721_vm7 = vmmov 1   ;;  %s272_s10 = scalar_lea.vmem [#allocation8], %s1195_s6 }
  0x6a   : > { %1695 = vsyncadd (%p2117_p8), [#allocation6], 4294962688  ;;  %1334 = vmatprep.subr.bf16.mxu0 %v1518_v2  ;;  %v276_v7 = vld [vmem:[%s238_s12] sm:$0xff]   ;;  %v1954_v8 = vld [vmem:[%s238_s12 + $0x8] sm:$0xff]   ;;  %s1093_s28 = sshll.u32 %s272_s10, 4  ;;  %s1274_s13 = sshll.u32 %s1776_s22, 8  ;;  %s2050_s28 = int_to_ptr.vmem [resolvable:$true] %s1093_s28 }
  0x6b   : > { %v1950_v1 = vshrl.u32 %v284_v0, 7  ;;  %1335 = vmatpush3.bf16.msra.mxu0 %v1518_v2  ;;  %v280_v10 = vunpack.c.l.bf16 %v276_v7  ;;  %v281_v11 = vunpack.c.h.bf16 %v276_v7  ;;  %v283_v12 = vunpack.c.h.bf16 %v1954_v8  ;;  %v1521_v18 = vld [vmem:[#allocation5 + $0x18] sm:$0xff]   ;;  %v1522_v28 = vld [vmem:[#allocation5 + $0x20] sm:$0xff]   ;;  %v1523_v32 = vld [vmem:[#allocation5 + $0x28] sm:$0xff]   ;;  %s2055_s11 = scalar_lea.hbm %s2104_s5, %s1274_s13  ;;  %s1079_s17 = scalar_lea.sflag [#allocation4], %s1936_s14 }
  0x6c   : > { %1336 = vmatprep.subr.bf16.mxu0 %v1519_v4  ;;  %v282_v13 = vunpack.c.l.bf16 %v1954_v8  ;;  %v1532_v31 = vld [vmem:[#allocation7 + $0x40] sm:$0xff]   ;;  %v1534_v34 = vld [vmem:[#allocation7 + $0x48] sm:$0xff]   ;;  %v1536_v37 = vld [vmem:[#allocation7 + $0x50] sm:$0xff]   ;;  %s1644_s22 = scalar_lea.vmem %s2050_s28, 256  ;;  %p2126_p0 = scmp.ne.s32.totalorder %s2113_s23, 0 }
  0x6d   : > { %v287_v3 = vadd.s32 16, %v1950_v1  ;;  %v293_v6 = vand.u32 15, %v1950_v1  ;;  %vm345_vm0 = vcmp.lt.s32.totalorder %v1950_v1, 1  ;;  %v341_v15 = vrot.slane %v280_v10, 7  ;;  %1390 = vmatprep.subr.bf16.mxu1 %v1532_v31  ;;  %v1524_v38 = vld [vmem:[#allocation5 + $0x30] sm:$0xff]   ;;  %v1538_v42 = vld [vmem:[#allocation7 + $0x58] sm:$0xff]   ;;  %p1645_p11 = scmp.ne.s32.totalorder %s2050_s28, %s1644_s22 }
  0x6e   : > { %v342_v16 = vrot.slane %v281_v11, 7  ;;  %v344_v17 = vrot.slane %v283_v12, 7  ;;  %v343_v20 = vrot.slane %v282_v13, 7  ;;  %v286_v29 = vadd.s32 8, %v1950_v1  ;;  %1391 = vmatpush3.bf16.msra.mxu1 %v1532_v31  ;;  %v1525_v44 = vld [vmem:[#allocation5 + $0x38] sm:$0xff]   ;;  %v1540_v46 = vld [vmem:[#allocation7 + $0x60] sm:$0xff]  }
  0x6f   : > { %v307_v9 = vand.u32 15, %v287_v3  ;;  %1337 = vmatpush3.bf16.msra.mxu0 %v1519_v4  ;;  %vm1959_vm1 = vcmp.ne.s32.totalorder %v293_v6, 0  ;;  %v359_v35 = vrot.slane %v281_v11, 1  ;;  %v360_v36 = vrot.slane %v282_v13, 1  ;;  %1392 = vmatprep.subr.bf16.mxu1 %v1534_v34  ;;  %v1527_v47 = vld [vmem:[#allocation5 + $0x40] sm:$0xff]   ;;  %v1542_v49 = vld [vmem:[#allocation7 + $0x68] sm:$0xff]   ;;  %p1646_p2 = pnand %p1645_p11, %p2126_p0 }
  0x70   : > { %1338 = vmatprep.subr.bf16.mxu0 %v1520_v5  ;;  %v348_v21 = vsel %vm345_vm0, %v341_v15, %v342_v16  ;;  %v349_v22 = vsel %vm345_vm0, %v344_v17, %v341_v15  ;;  %v347_v24 = vsel %vm345_vm0, %v342_v16, %v343_v20  ;;  %v346_v26 = vsel %vm345_vm0, %v343_v20, %v344_v17  ;;  %v1529_v50 = vld [vmem:[#allocation5 + $0x48] sm:$0xff]   ;;  %v1530_v53 = vld [vmem:[#allocation5 + $0x50] sm:$0xff]   ;;  %v1531_v55 = vld [vmem:[#allocation5 + $0x58] sm:$0xff]   ;;  %s1722_s7 = smov [#allocation8]  }
  0x71   : > { %vm1965_vm2 = vcmp.ne.s32.totalorder %v307_v9, 0  ;;  %v350_v23 = vsel %vm1959_vm1, %v349_v22, 0.0  ;;  %v300_v33 = vand.u32 15, %v286_v29  ;;  %vm362_vm4 = vcmp.lt.s32.totalorder %v1950_v1, 7  ;;  %v1533_v60 = vld [vmem:[#allocation7] sm:$0xff]   ;;  %v1535_v62 = vld [vmem:[#allocation7 + $0x8] sm:$0xff]   ;;  %vm1228_vm8 = vmpackc.low %vm1721_vm7, %vm1959_vm1  ;;  %p1647_p3 = pneg %p1646_p2 }
  0x72   : > { %v380_v25 = vpack.c.bf16 %v348_v21, %v350_v23  ;;  %v352_v27 = vsel %vm1965_vm2, %v347_v24, 0.0  ;;  %v364_v40 = vsel %vm362_vm4, %v359_v35, %v360_v36  ;;  %1393 = vmatpush3.bf16.msra.mxu1 %v1534_v34  ;;  %v288_v41 = vadd.s32 24, %v1950_v1  ;;  %v1537_v63 = vld [vmem:[#allocation7 + $0x10] sm:$0xff]   ;;  %v1539_v0 = vld [vmem:[#allocation7 + $0x18] sm:$0xff]   ;;  %v1541_v2 = vld [vmem:[#allocation7 + $0x20] sm:$0xff]   ;;  %s1648_s6 = sshll.u32 %s1722_s7, 4  ;;  %s1649_s6 = int_to_ptr.vmem [resolvable:$false] %s1648_s6 }
  0x73   : > { %1339 = vmatpush3.bf16.msra.mxu0 %v1520_v5  ;;  %v381_v30 = vpack.c.bf16 %v346_v26, %v352_v27  ;;  %vm1986_vm5 = vcmp.ne.s32.totalorder %v300_v33, 15  ;;  %1394 = vmatprep.subr.bf16.mxu1 %v1536_v37  ;;  %v358_v43 = vrot.slane %v280_v10, 1  ;;  %v361_v52 = vrot.slane %v283_v12, 1  ;;  %v1543_v3 = vld [vmem:[#allocation7 + $0x28] sm:$0xff]   ;;  %v1544_v4 = vld [vmem:[#allocation7 + $0x70] sm:$0xff]   ;;  %v1546_v6 = vld [vmem:[#allocation7 + $0x78] sm:$0xff]   ;;  %p1651_p7 = scmp.lt.s32.totalorder %s2050_s28, %s1649_s6 }
  0x74   : > { %1340 = vmatprep.subr.bf16.mxu0 %v1521_v18  ;;  %1342 = vmatprep.mubr.msk.bf16.mxu0 %vm414_vm3, %v380_v25  ;;  %v368_v45 = vsel %vm1986_vm5, %v364_v40, 0.0  ;;  %v314_v54 = vand.u32 15, %v288_v41  ;;  %v1545_v5 = vld [vmem:[#allocation7 + $0x30] sm:$0xff]   ;;  %v1219_v9 = vld [vmem:[%s2101_s2] ss:$0 sm:$0xff]  ;;  %vm1250_vm9 = vmpackc.low %vm1986_vm5, %vm1721_vm7  ;;  %s1650_s8 = scalar_lea.vmem %s1649_s6, 512 }
  0x75   : > { %v365_v48 = vsel %vm362_vm4, %v358_v43, %v359_v35  ;;  %v366_v57 = vsel %vm362_vm4, %v361_v52, %v358_v43  ;;  %v363_v58 = vsel %vm362_vm4, %v360_v36, %v361_v52  ;;  %vm1231_vm10 = vmpackc.low %vm1721_vm7, %vm1965_vm2  ;;  %v1551_v39 = vld [vmem:[#allocation7 + $0x98] sm:$0xff]   ;;  %v1553_v1 = vld [vmem:[#allocation7 + $0xa8] sm:$0xff]   ;;  %p1652_p9 = scmp.lt.s32.totalorder %s1650_s8, %s1644_s22 }
  0x76   : > { %1395 = vmatpush3.bf16.msra.mxu1 %v1536_v37  ;;  %v559_v51 = vpack.c.bf16 %v368_v45, %v365_v48  ;;  %vm2002_vm6 = vcmp.ne.s32.totalorder %v314_v54, 15  ;;  %v1552_v48 = vld [vmem:[#allocation7 + $0xa0] sm:$0xff]   ;;  %v1554_v19 = vld [vmem:[#allocation7 + $0xb0] sm:$0xff]  }
  0x77   : > { %1341 = vmatpush3.bf16.msra.mxu0 %v1521_v18  ;;  %1396 = vmatprep.subr.bf16.mxu1 %v1538_v42  ;;  %v370_v59 = vsel %vm2002_vm6, %v366_v57, 0.0  ;;  %vm1253_vm11 = vmpackc.low %vm2002_vm6, %vm1721_vm7  ;;  %p1653_p12 = por %p1652_p9, %p1651_p7 }
  0x78   : > { %1346 = vmatprep.subr.bf16.mxu0 %v1522_v28  ;;  %v560_v61 = vpack.c.bf16 %v370_v59, %v363_v58 }
  0x79   : > { %p1654_p1 = pnand %p1653_p12, %p1647_p3 }
  0x7a   : > { %1343 = vmatmul.mubr.msk.bf16.vlgmr.msra.gmra.mrb[0].mxu0 %vm414_vm3, %v381_v30  ;;  %1397 = vmatpush3.bf16.msra.mxu1 %v1538_v42 }
  0x7b   : > { %1347 = vmatpush3.bf16.msra.mxu0 %v1522_v28  ;;  %1354 = vmatprep.mubr.msk.bf16.mxu0 %vm414_vm3, %v276_v7  ;;  %v1547_v7 = vld [vmem:[#allocation7 + $0x38] sm:$0xff]  }
  0x7c   : > { %1348 = vmatprep.subr.bf16.mxu0 %v1523_v32  ;;  %1398 = vmatprep.subr.bf16.mxu1 %v1540_v46 }
  0x7e   : > { %1399 = vmatpush3.bf16.msra.mxu1 %v1540_v46 }
  0x7f   : > { %1349 = vmatpush3.bf16.msra.mxu0 %v1523_v32  ;;  %1400 = vmatprep.subr.bf16.mxu1 %v1542_v49 }
  0x80   : > { %1350 = vmatprep.subr.bf16.mxu0 %v1524_v38 }
  0x82   : > { %1401 = vmatpush3.bf16.msra.mxu1 %v1542_v49  ;;  %v1555_v49 = vld [vmem:[#allocation7 + $0xb8] sm:$0xff]  }
  0x83   : > { %1351 = vmatpush3.bf16.msra.mxu0 %v1524_v38  ;;  %1402 = vmatprep.subr.bf16.mxu1 %v1544_v4  ;;  %v1549_v38 = vld [vmem:[#allocation7 + $0x88] sm:$0xff]  }
  0x84   : > { %1352 = vmatprep.subr.bf16.mxu0 %v1525_v44 }
  0x86   : > { %1403 = vmatpush3.bf16.msra.mxu1 %v1544_v4 }
  0x87   : > { %1353 = vmatpush3.bf16.msra.mxu0 %v1525_v44  ;;  %1404 = vmatprep.subr.bf16.mxu1 %v1546_v6 }
  0x88   : > { %1358 = vmatprep.subr.bf16.mxu0 %v1527_v47 }
  0x8a   : > { %1355 = vmatmul.mubr.msk.bf16.vlgmr.msra.gmra.mrb[0].mxu0 %vm414_vm3, %v1954_v8  ;;  %1405 = vmatpush3.bf16.msra.mxu1 %v1546_v6  ;;  %v1548_v8 = vld [vmem:[#allocation7 + $0x80] sm:$0xff]  }
  0x8b   : > { %1359 = vmatpush3.bf16.msra.mxu0 %v1527_v47  ;;  %1366 = vmatprep.mubr.msk.bf16.mxu0 %vm414_vm3, %v559_v51  ;;  %v1550_v47 = vld [vmem:[#allocation7 + $0x90] sm:$0xff]  }
  0x8c   : > { %1360 = vmatprep.subr.bf16.mxu0 %v1529_v50  ;;  %1410 = vmatprep.subr.bf16.mxu1 %v1548_v8 }
  0x8f   : > { %1361 = vmatpush3.bf16.msra.mxu0 %v1529_v50 }
  0x90   : > { %1362 = vmatprep.subr.bf16.mxu0 %v1530_v53 }
  0x93   : > { %1363 = vmatpush3.bf16.msra.mxu0 %v1530_v53 }
  0x94   : > { %1364 = vmatprep.subr.bf16.mxu0 %v1531_v55 }
  0x97   : > { %1365 = vmatpush3.bf16.msra.mxu0 %v1531_v55  ;;  %v1256_v55 = vld [vmem:[%s2103_s4] ss:$0 sm:$0xff] }
  0x98   : > { %1370 = vmatprep.subr.bf16.mxu0 %v1533_v60 }
  0x9a   : > { %1367 = vmatmul.mubr.msk.bf16.vlgmr.msra.gmra.mrb[0].mxu0 %vm414_vm3, %v560_v61 }
  0x9b   : > { %1371 = vmatpush3.bf16.msra.mxu0 %v1533_v60 }
  0x9c   : > { %1372 = vmatprep.subr.bf16.mxu0 %v1535_v62 }
  0x9f   : > { %1373 = vmatpush3.bf16.msra.mxu0 %v1535_v62 }
  0xa0   : > { %1374 = vmatprep.subr.bf16.mxu0 %v1537_v63 }
  0xa3   : > { %1375 = vmatpush3.bf16.msra.mxu0 %v1537_v63 }
  0xa4   : > { %1376 = vmatprep.subr.bf16.mxu0 %v1539_v0 }
  0xa7   : > { %1377 = vmatpush3.bf16.msra.mxu0 %v1539_v0 }
  0xa8   : > { %1378 = vmatprep.subr.bf16.mxu0 %v1541_v2 }
  0xab   : > { %1379 = vmatpush3.bf16.msra.mxu0 %v1541_v2 }
  0xac   : > { %1380 = vmatprep.subr.bf16.mxu0 %v1543_v3 }
  0xaf   : > { %1381 = vmatpush3.bf16.msra.mxu0 %v1543_v3 }
  0xb0   : > { %1382 = vmatprep.subr.bf16.mxu0 %v1545_v5 }
  0xb3   : > { %1383 = vmatpush3.bf16.msra.mxu0 %v1545_v5 }
  0xb4   : > { %1384 = vmatprep.subr.bf16.mxu0 %v1547_v7 }
  0xb7   : > { %1385 = vmatpush3.bf16.msra.mxu0 %v1547_v7 }
 0x16d   : > { %v1368_v10 = vpop.f32.mrb[0].mxu0 }
 0x16e   : > { %v662_v11 = vadd.f32 %v1368_v10, %v1219_v9  ;;  %v634_v12 = vpop.f32.mrb[1].mxu0 }
 0x16f   : > { %v660_v13 = vadd.f32 %v1219_v9, %v634_v12  ;;  %v1369_v15 = vpop.f32.mrb[2].mxu0 }
 0x170   : > { %v666_v16 = vmax.f32 %v662_v11, 0.0  ;;  %v663_v17 = vadd.f32 %v1369_v15, %v1219_v9  ;;  %v637_v18 = vpop.f32.mrb[3].mxu0 }
 0x171   : > { %v664_v20 = vmax.f32 %v660_v13, 0.0  ;;  %v661_v21 = vadd.f32 %v1219_v9, %v637_v18 }
 0x172   : > { %v667_v22 = vmax.f32 %v663_v17, 0.0  ;;  %v672_v23 = vrot.slane %v666_v16, 7  ;;  %v684_v27 = vrot.slane %v666_v16, 1 }
 0x173   : > { %v670_v24 = vrot.slane %v664_v20, 7  ;;  %v682_v25 = vrot.slane %v664_v20, 1  ;;  %v665_v26 = vmax.f32 %v661_v21, 0.0 }
 0x174   : > { %v673_v28 = vrot.slane %v667_v22, 7  ;;  %v685_v29 = vrot.slane %v667_v22, 1  ;;  %v669_v30 = vpack.c.bf16 %v667_v22, %v666_v16 }
 0x175   : > { %v671_v31 = vrot.slane %v665_v26, 7  ;;  %v683_v32 = vrot.slane %v665_v26, 1  ;;  %v668_v33 = vpack.c.bf16 %v665_v26, %v664_v20 }
 0x176   : > { %v674_v34 = vsel %vm345_vm0, %v672_v23, %v673_v28  ;;  %v686_v35 = vsel %vm362_vm4, %v684_v27, %v685_v29  ;;  %v689_v36 = vsel %vm362_vm4, %v685_v29, %v682_v25  ;;  %v677_v37 = vsel %vm345_vm0, %v673_v28, %v670_v24 }
 0x177   : > { %v1254_v40 = vpack.c.bf16 %v689_v36, %v686_v35  ;;  %v675_v41 = vsel %vm345_vm0, %v671_v31, %v672_v23  ;;  %1406 = vmatprep.mubr.bf16.mxu1 %v668_v33  ;;  %v676_v42 = vsel %vm345_vm0, %v670_v24, %v671_v31  ;;  %v687_v43 = vsel %vm362_vm4, %v683_v32, %v684_v27 }
 0x178   : > { %v1232_v44 = vpack.c.bf16 %v674_v34, %v675_v41  ;;  %1407 = vmatmul.mubr.bf16.vlgmr.msra.gmra.mrb[0].mxu1 %v669_v30  ;;  %v1229_v14 = vpack.c.bf16 %v676_v42, %v677_v37  ;;  %v688_v45 = vsel %vm362_vm4, %v682_v25, %v683_v32 }
 0x179   : > { %1411 = vmatpush3.bf16.msra.mxu1 %v1548_v8  ;;  %v1251_v46 = vpack.c.bf16 %v687_v43, %v688_v45 }
 0x17a   : > { %1386 = vmatprep.mubr.msk.bf16.mxu0 %vm1228_vm8, %v1229_v14  ;;  %1412 = vmatprep.subr.bf16.mxu1 %v1549_v38 }
 0x17b   : > { %1426 = vmatprep.mubr.msk.bf16.mxu1 %vm1250_vm9, %v1251_v46  ;;  %1387 = vmatmul.mubr.msk.bf16.vlgmr.msra.gmra.mrb[4].mxu0 %vm1231_vm10, %v1232_v44 }
 0x17d   : > { %1413 = vmatpush3.bf16.msra.mxu1 %v1549_v38 }
 0x17e   : > { %1414 = vmatprep.subr.bf16.mxu1 %v1550_v47 }
 0x181   : > { %1415 = vmatpush3.bf16.msra.mxu1 %v1550_v47 }
 0x182   : > { %1416 = vmatprep.subr.bf16.mxu1 %v1551_v39 }
 0x185   : > { %1417 = vmatpush3.bf16.msra.mxu1 %v1551_v39 }
 0x186   : > { %1418 = vmatprep.subr.bf16.mxu1 %v1552_v48 }
 0x189   : > { %1419 = vmatpush3.bf16.msra.mxu1 %v1552_v48 }
 0x18a   : > { %1420 = vmatprep.subr.bf16.mxu1 %v1553_v1 }
 0x18d   : > { %1421 = vmatpush3.bf16.msra.mxu1 %v1553_v1 }
 0x18e   : > { %1422 = vmatprep.subr.bf16.mxu1 %v1554_v19 }
 0x191   : > { %1423 = vmatpush3.bf16.msra.mxu1 %v1554_v19 }
 0x192   : > { %1424 = vmatprep.subr.bf16.mxu1 %v1555_v49 }
 0x195   : > { %1425 = vmatpush3.bf16.msra.mxu1 %v1555_v49 }
 0x198   : > { %1427 = vmatmul.mubr.msk.bf16.vlgmr.msra.gmra.mrb[0].mxu1 %vm1253_vm11, %v1254_v40 }
 0x24e   : > { %v1388_v50 = vpop.f32.mrb[4].mxu0 }
 0x24f   : > { %v811_v51 = vpop.f32.mrb[5].mxu0 }
 0x250   : > { %v1389_v52 = vpop.f32.mrb[6].mxu0 }
 0x251   : > { %v814_v53 = vpop.f32.mrb[7].mxu0 }
 0x26b   : > { %v1428_v54 = vpop.f32.mrb[0].mxu1 }
 0x26c   : > { %v1430_v57 = vadd.f32 %v1428_v54, %v1388_v50  ;;  %v1024_v58 = vpop.f32.mrb[1].mxu1 }
 0x26d   : > { %v1431_v59 = vadd.f32 %v1024_v58, %v811_v51  ;;  %v1429_v60 = vpop.f32.mrb[2].mxu1 }
 0x26e   : > { %v1052_v61 = vadd.f32 %v1430_v57, %v1256_v55  ;;  %v1432_v62 = vadd.f32 %v1429_v60, %v1389_v52  ;;  %v1027_v56 = vpop.f32.mrb[3].mxu1 }
 0x26f   : > { %v1050_v63 = vadd.f32 %v1431_v59, %v1256_v55  ;;  %v1433_v0 = vadd.f32 %v1027_v56, %v814_v53 }
 0x270   : > { %v1053_v2 = vadd.f32 %v1432_v62, %v1256_v55  ;;  %v1056_v4 = vmax.f32 %v1052_v61, 0.0 }
 0x271   : > { %v1051_v3 = vadd.f32 %v1433_v0, %v1256_v55  ;;  %v1054_v6 = vmax.f32 %v1050_v63, 0.0 }
 0x272   : > { %v1057_v5 = vmax.f32 %v1053_v2, 0.0 }
 0x273   : > { %v1055_v7 = vmax.f32 %v1051_v3, 0.0 }
 0x274   : > { %v1283_v8 = vpack.c.bf16 %v1057_v5, %v1056_v4 }
 0x275   : > { %v1278_v9 = vpack.c.bf16 %v1055_v7, %v1054_v6 }
 0x276   : > { %1285 = vst [vmem:[%s272_s10 + $0x8] sm:$0xff] %v1283_v8  }
 0x277   : > { %1279 = vst [vmem:[%s272_s10] sm:$0xff] %v1278_v9  }
 0x278   : > { %1657 = shalt.err (!%p1654_p1)
}
 0x279   : > { %s1658_s12 = scalar_lea.hbm %s2055_s11, 256  ;;  %s1662_s15 = scalar_lea.hbm %s2104_s5, 512 }
 0x27a   : > { %p1659_p13 = scmp.ne.s32.totalorder %s2055_s11, %s1658_s12  ;;  %p1663_p4 = scmp.lt.u32.totalorder %s2055_s11, %s2104_s5 }
 0x27b   : > { %p1664_p5 = scmp.lt.u32.totalorder %s1662_s15, %s1658_s12  ;;  %p1666_p11 = scmp.lt.u32.totalorder %s1658_s12, %s2055_s11 }
 0x27c   : > { %p1660_p6 = pnand %p1659_p13, %p2126_p0 }
 0x27d   : > { %p1665_p8 = por %p1664_p5, %p1663_p4 }
 0x27e   : > { %p1661_p10 = pneg %p1660_p6 }
 0x27f   : > { %p1667_p2 = por %p1666_p11, %p1665_p8 }
 0x281   : > { %p1668_p3 = pnand %p1667_p2, %p1661_p10 }
 0x283   : > { %1671 = shalt.err (!%p1668_p3)
}
 0x284   : > { %s1723_s13 = smov 64   ;;  %s1724_s9 = smov 4  }
 0x285   : > { %1456 = dma.vmem_to_hbm [thread:$0]  (%p2126_p0), %s2050_s28, 256, %s2055_s11, %s1079_s17, %s1723_s13, %s1723_s13, %s1724_s9  }
 0x286 PF: > { %s1108_s30 = sand.u32 1, %s1702_s18   ;;  %p2127_p7 = scmp.ne.s32.totalorder %s2109_s25, 0 }
 0x287   : > { %p2128_p9 = scmp.ge.s32.totalorder %s1714_s21, 2  ;;  %s1109_s22 = scalar_lea.sflag [#allocation4], %s1108_s30 }
 0x289   : > { %p1470_p12 = pnand %p2128_p9, %p2127_p7 }
 0x28b   : > { %1697 = dma.done.wait (!%p1470_p12), %s1109_s22, 256  }
 0x28c   : > { %1699 = vsyncadd (!%p1470_p12), %s1109_s22, 4294967040  ;;  %p19_p1 = scmp.ge.s32.totalorder %s1871_s29, 4   ;;  %s2129_s18 = smov %s1706_s19 }
 0x28d   : > { %s2130_s19 = smov %s1710_s20  ;;  %s2131_s20 = smov %s1887_s27 }
 0x28e   : > { %s2132_s21 = smov %s1871_s29  ;;  %21 = sbr.rel (!%p19_p1) target bundleno = 6 (0x6), region = 97 }
 0x295   :  { %1114 = vsyncpa [#allocation3], 1 }
 0x296   :  { %1116 = vsyncpa [#allocation3 + $0x1], 1 }
 0x297   :  { %1117 = vsyncpa [#allocation6], 1 }
 0x298   :  { %1118 = vsyncpa [#allocation4], 1 }
 0x299   :  { %1120 = vsyncpa [#allocation4 + $0x1], 1 }

</bundles_post_ra>
